<compile_context>
chip_gen: v7x
topology: tpu7x:2x2x1
jax: 0.10.0
libtpu: 0.0.40
codegen_flags: <defaults>
</compile_context>

<pallas_src>
import math

import jax
import jax.numpy as jnp
from jax.experimental import pallas as pl
from jax.experimental.pallas import tpu as pltpu

LANE = 128
_WIDTHS = (4096, 3072, 2048, 1536, 1280, 1024, 768, 640, 512, 384, 256, 128)


def _round_up(a, m):
    return ((a + m - 1) // m) * m


def funct_kernel(alpha_ref, beta_ref, x_ref, o_ref):
    # alpha/beta live in SMEM as (1,) scalars; x/o are VMEM tiles.
    a = alpha_ref[0]
    b = beta_ref[0]
    x = x_ref[...].astype(jnp.float32)       # VPU mul -> EUP tanh -> VPU mul
    o_ref[...] = (b * jnp.tanh(a * x)).astype(o_ref.dtype)


def _chip_params():
    """Per-generation (input_tile_bytes, vmem_limit_bytes)."""
    vmem_cap = 64 << 20                       # conservative default (v7x-class)
    try:
        vmem_cap = int(getattr(pltpu.get_tpu_info(),
                               "vmem_capacity_bytes", vmem_cap))
    except Exception:
        pass
    if vmem_cap <= (64 << 20):
        # v7x: 64 MiB physical VMEM. 8 MiB tile -> 32 MiB double-buffered.
        return 8 << 20, 56 << 20
    # v5e / v6e: 128 MiB physical VMEM, but small scoped-VMEM defaults
    # (16 / 32 MiB) -- raise the limit explicitly.
    return 8 << 20, 64 << 20


def _pick_layout(n, shape):
    """(rows, width) for a copy-free reshape of the flat element stream."""
    for w in _WIDTHS:                         # widest lane-aligned slab with >=8 rows
        if n % w == 0 and n // w >= 8:
            return n // w, w
    if n % LANE == 0:                         # tiny arrays: < 8 rows at width 128
        return n // LANE, LANE
    # Ragged element count: keep the original trailing dim as the lane axis
    # (block lane dim == full array dim) -> no pad / slice copies.
    if len(shape) >= 2 and shape[-1] > 0:
        return math.prod(shape[:-1]), shape[-1]
    # 0-D / 1-D ragged: single row; columns get blocked (last block masked).
    return 1, n


def funct_forward(x, alpha, beta):
    """Elementwise beta * tanh(alpha * x). Any shape, any float dtype."""
    orig_shape = x.shape
    dtype = x.dtype
    n = x.size
    if n == 0:
        return x

    itemsize = jnp.dtype(dtype).itemsize
    pack = max(8, 32 // itemsize)             # sublane pack: 8 f32, 16 bf16, 32 i8
    tile_bytes, vmem_limit = _chip_params()

    rows, width = _pick_layout(n, orig_shape)
    x2d = x.reshape(rows, width)              # contiguous reshape -> no HBM copy

    # --- column blocking (only needed if one row-chunk would blow the budget)
    lanes_pad = _round_up(width, LANE)        # VMEM lane footprint of one row
    max_cols = max(LANE, (tile_bytes // (pack * itemsize)) // LANE * LANE)
    if lanes_pad <= max_cols:
        block_cols, cols_fp = width, lanes_pad    # block dim == full array dim
    else:
        block_cols = cols_fp = max_cols           # multiple of 128; last block masked

    # --- row blocking: biggest tile under the budget, sublane-pack aligned
    target_rows = max(pack, (tile_bytes // (cols_fp * itemsize)) // pack * pack)
    block_rows = min(rows, target_rows)
    if block_rows < rows:
        block_rows = max(pack, block_rows // pack * pack)

    # Keep >= 2 grid steps when possible so both v7x TensorCores stream
    # ("parallel" semantics shard the grid); harmless on single-TC v5e/v6e.
    if pl.cdiv(rows, block_rows) * pl.cdiv(width, block_cols) == 1 and rows > pack:
        block_rows = max(pack, _round_up(pl.cdiv(rows, 2), pack))

    grid = (pl.cdiv(rows, block_rows), pl.cdiv(width, block_cols))

    alpha1 = jnp.asarray(alpha, dtype=jnp.float32).reshape(1)
    beta1 = jnp.asarray(beta, dtype=jnp.float32).reshape(1)

    out2d = pl.pallas_call(
        funct_kernel,
        out_shape=jax.ShapeDtypeStruct((rows, width), dtype),
        grid_spec=pl.GridSpec(
            grid=grid,
            in_specs=[
                pl.BlockSpec(memory_space=pltpu.MemorySpace.SMEM),   # alpha
                pl.BlockSpec(memory_space=pltpu.MemorySpace.SMEM),   # beta
                pl.BlockSpec((block_rows, block_cols), lambda i, j: (i, j)),
            ],
            out_specs=pl.BlockSpec((block_rows, block_cols), lambda i, j: (i, j)),
        ),
        compiler_params=pltpu.CompilerParams(
            dimension_semantics=("parallel", "parallel"),
            vmem_limit_bytes=vmem_limit,
        ),
    )(alpha1, beta1, x2d)

    return out2d.reshape(orig_shape)


if __name__ == "__main__":
    # Deterministic parameters (module __init__ with initialisation=0.5).
    alpha = jnp.float32(0.5)
    beta = jnp.float32(0.5)

    # Deterministic example input, NCHW like the PyTorch module would see.
    key = jax.random.PRNGKey(0)
    x = jax.random.normal(key, (2, 4, 16, 16), dtype=jnp.float32)

    out = jax.block_until_ready(funct_forward(x, alpha, beta))

    # Reference check in plain JAX.
    ref = beta * jnp.tanh(alpha * x)
    assert out.shape == x.shape and out.dtype == x.dtype
    assert jnp.allclose(out, ref, atol=1e-6, rtol=1e-6)

    print("KERNEL_OK")
</pallas_src>

<mosaic_0001>
module attributes {stable_mosaic.version = 11 : i64} {
  func.func @funct_kernel(%arg0: i32, %arg1: i32, %arg2: memref<1xf32, #tpu.memory_space<smem>>, %arg3: memref<1xf32, #tpu.memory_space<smem>>, %arg4: memref<8x256xf32, #tpu.memory_space<vmem>>, %arg5: memref<8x256xf32, #tpu.memory_space<vmem>>) attributes {dimension_semantics = [#tpu.dimension_semantics<parallel>, #tpu.dimension_semantics<parallel>], iteration_bounds = array<i64: 1, 1>, scalar_prefetch = 0 : i64, scratch_operands = 0 : i64, tpu.core_type = #tpu.core_type<tc>, window_params = [{transform_indices = @transform_0, window_bounds = array<i64: 1>}, {transform_indices = @transform_1, window_bounds = array<i64: 1>}, {transform_indices = @transform_2, window_bounds = array<i64: 8, 256>}, {transform_indices = @transform_3, window_bounds = array<i64: 8, 256>}]} {
    %c0 = arith.constant 0 : index
    %0 = memref.load %arg2[%c0] : memref<1xf32, #tpu.memory_space<smem>>
    %c0_0 = arith.constant 0 : index
    %1 = memref.load %arg3[%c0_0] : memref<1xf32, #tpu.memory_space<smem>>
    %c0_1 = arith.constant 0 : index
    %c0_2 = arith.constant 0 : index
    %2 = vector.load %arg4[%c0_1, %c0_2] : memref<8x256xf32, #tpu.memory_space<vmem>>, vector<8x256xf32>
    %3 = vector.broadcast %0 : f32 to vector<8x256xf32>
    %4 = arith.mulf %3, %2 : vector<8x256xf32>
    %5 = math.tanh %4 : vector<8x256xf32>
    %6 = vector.broadcast %1 : f32 to vector<8x256xf32>
    %7 = arith.mulf %6, %5 : vector<8x256xf32>
    %c0_3 = arith.constant 0 : index
    %c0_4 = arith.constant 0 : index
    %8 = vector.load %arg5[%c0_3, %c0_4] : memref<8x256xf32, #tpu.memory_space<vmem>>, vector<8x256xf32>
    tpu.vector_store %arg5[%c0_3, %c0_4], %7 {strides = array<i32>} : memref<8x256xf32, #tpu.memory_space<vmem>>, vector<8x256xf32>,
    return
  }
  func.func @transform_0(%arg0: i32, %arg1: i32) -> i32 {
    %c0_i32 = arith.constant 0 : i32
    %c0_i32_0 = arith.constant 0 : i32
    return %c0_i32 : i32
  }
  func.func @transform_1(%arg0: i32, %arg1: i32) -> i32 {
    %c0_i32 = arith.constant 0 : i32
    %c0_i32_0 = arith.constant 0 : i32
    return %c0_i32 : i32
  }
  func.func @transform_2(%arg0: i32, %arg1: i32) -> (i32, i32) {
    %c0_i32 = arith.constant 0 : i32
    return %arg0, %arg1 : i32, i32
  }
  func.func @transform_3(%arg0: i32, %arg1: i32) -> (i32, i32) {
    %c0_i32 = arith.constant 0 : i32
    return %arg0, %arg1 : i32, i32
  }
}

</mosaic_0001>

<bundles_post_ra>
// kernel: tpu_custom_call.1
= control target key start
LH: loop header
LB: loop body
LE: loop exit
PB: predicated region body
PF: predicated region fallthrough
CT: control target
= control target key end

     0   :  { %10 = vsyncpa [#allocation5], 0  ;;  %s164_s0 = inlined_call_operand.<no memory space> [shape: f32[1], index: 0, kind: input, shape index: {}]   ;;  %s165_s1 = inlined_call_operand.<no memory space> [shape: f32[1], index: 1, kind: input, shape index: {}]   ;;  %s166_s2 = inlined_call_operand.hbm [shape: f32[8,256], index: 2, kind: input, shape index: {}]   ;;  %s167_s3 = inlined_call_operand.hbm [shape: f32[8,256], index: 3, kind: output, shape index: {}]  }
   0x1   :  { %11 = vsyncpa [#allocation6], 0  ;;  %s112_s12 = smov [#allocation4]   ;;  %s64_s16 = scalar_lea.hbm %s166_s2, 256 }
   0x2   :  { %s22_s13 = sshll.u32 %s112_s12, 4  ;;  %p65_p0 = scmp.ne.s32.totalorder %s166_s2, %s64_s16  ;;  %s23_s13 = int_to_ptr.vmem [resolvable:$true] %s22_s13 }
   0x3   :  { %p68_p1 = scmp.lt.u32.totalorder %s64_s16, %s166_s2 }
   0x5   :  { %p70_p2 = pnand %p68_p1, %p65_p0 }
   0x7   :  { %73 = shalt.err (!%p70_p2)
}
   0x8   :  { %s74_s21 = scalar_lea.vmem %s23_s13, 256  ;;  %p79_p4 = scmp.lt.s32.totalorder %s23_s13, %s23_s13 }
   0x9   :  { %p75_p3 = scmp.ne.s32.totalorder %s23_s13, %s74_s21  ;;  %p80_p5 = scmp.lt.s32.totalorder %s74_s21, %s74_s21 }
   0xb   :  { %p81_p6 = por %p80_p5, %p79_p4 }
   0xd   :  { %p82_p7 = pnand %p81_p6, %p75_p3 }
   0xf   :  { %85 = shalt.err (!%p82_p7)
}
  0x10   :  { %25 = dma.hbm_to_vmem [thread:$0]  %s166_s2, 256, %s23_s13, [#allocation5]  }
  0x11   :  { %108 = dma.done.wait [#allocation5], 256  }
  0x12   :  { %109 = vsyncadd [#allocation5], 4294967040  ;;  %v33_v0 = vstv %s164_s0  ;;  %v31_v1 = vld [vmem:[#allocation4] sm:$0xff]  ;;  %v32_v2 = vld [vmem:[#allocation4 + $0x8] sm:$0xff]  ;;  %v38_v5 = vstv %s165_s1  ;;  %s113_s28 = smov [#allocation7]  }
  0x13   :  { %v34_v3 = vmul.f32 %v33_v0, %v31_v1  ;;  %v35_v4 = vmul.f32 %v33_v0, %v32_v2  ;;  %s49_s29 = sshll.u32 %s113_s28, 4  ;;  %s50_s29 = int_to_ptr.vmem [resolvable:$true] %s49_s29 }
  0x14   :  { %s86_s0 = scalar_lea.vmem %s50_s29, 256  ;;  %p91_p9 = scmp.lt.s32.totalorder %s50_s29, %s50_s29 }
  0x15   :  { %60 = vtanh.f32 %v34_v3  ;;  %p87_p8 = scmp.ne.s32.totalorder %s50_s29, %s86_s0  ;;  %p92_p10 = scmp.lt.s32.totalorder %s86_s0, %s86_s0 }
  0x16   :  { %62 = vtanh.f32 %v35_v4 }
  0x17   :  { %p93_p11 = por %p92_p10, %p91_p9 }
  0x19   :  { %p94_p12 = pnand %p93_p11, %p87_p8 }
  0x1f   :  { %v61_v6 = vpop.eup %60 }
  0x20   :  { %v63_v7 = vpop.eup %62  ;;  %v39_v8 = vmul.f32 %v61_v6, %v38_v5 }
  0x21   :  { %v40_v9 = vmul.f32 %v63_v7, %v38_v5 }
  0x22   :  { %41 = vst [vmem:[#allocation7] sm:$0xff] %v39_v8 }
  0x23   :  { %42 = vst [vmem:[#allocation7 + $0x8] sm:$0xff] %v40_v9 }
  0x24   :  { %97 = shalt.err (!%p94_p12)
}
  0x25   :  { %s98_s1 = scalar_lea.hbm %s167_s3, 256 }
  0x26   :  { %p99_p13 = scmp.ne.s32.totalorder %s167_s3, %s98_s1  ;;  %p102_p0 = scmp.lt.u32.totalorder %s98_s1, %s167_s3 }
  0x28   :  { %p104_p1 = pnand %p102_p0, %p99_p13 }
  0x2a   :  { %107 = shalt.err (!%p104_p1)
}
  0x2b   :  { %52 = dma.vmem_to_hbm [thread:$0]  %s50_s29, 256, %s167_s3, [#allocation6]  }
  0x2c   :  { %110 = dma.done.wait [#allocation6], 256  }
  0x2d   :  { %111 = vsyncadd [#allocation6], 4294967040 }
  0x2e   :  { %56 = vsyncpa [#allocation5], 1 }
  0x2f   :  { %57 = vsyncpa [#allocation6], 1 }

</bundles_post_ra>
